<compile_context>
chip_gen: v7x
topology: tpu7x:2x2x1
jax: 0.10.0
libtpu: 0.0.40
codegen_flags: <defaults>
</compile_context>

<pallas_src>
import functools

import jax
import jax.numpy as jnp
import numpy as np
from jax import lax
from jax.experimental import pallas as pl
from jax.experimental.pallas import tpu as pltpu


# --------------------------------------------------------------------------- #
# Kernel
# --------------------------------------------------------------------------- #
def _self_output_kernel(x_ref, wT_ref, p_ref, o_ref, *, eps):
    """One (tm, H) row tile of the fused BHViTSelfOutput forward."""
    f32 = jnp.float32
    x = x_ref[...].astype(f32)                       # residual path, f32

    # Packed per-channel parameters (already folded on the host), all (1, H) f32.
    b_eff   = p_ref[0:1, :]                          # bias + move @ W^T
    gamma   = p_ref[1:2, :]                          # LN scale
    beta_m1 = p_ref[2:3, :]                          # LN shift - RPReLU move1
    pw      = p_ref[3:4, :]                          # per-channel PReLU slope
    scale   = p_ref[4:5, :]                          # LayerScale alpha
    shift   = p_ref[5:6, :]                          # move2*alpha + LayerScale move

    # Dense: bf16 operands on the MXU, f32 accumulation.  Weight block is already
    # bf16 (cast once on the host), only the activation tile is cast here.
    d = jnp.dot(x_ref[...].astype(jnp.bfloat16), wT_ref[...],
                preferred_element_type=f32) + b_eff

    # LayerNorm over the hidden dim (f32, two-pass for numerical stability).
    mean = jnp.mean(d, axis=-1, keepdims=True)
    c = d - mean
    var = jnp.mean(c * c, axis=-1, keepdims=True)
    n = c * lax.rsqrt(var + eps) * gamma

    # + (beta - move1) folds LN shift with the RPReLU pre-shift; add the residual.
    t = n + beta_m1 + x

    # Per-channel PReLU.
    t = jnp.where(t >= 0, t, pw * t)

    # Dropout is identity at inference; RPReLU move2 and LayerScale are folded:
    #   out = (t + move2) * alpha + ls_move = t * alpha + (move2*alpha + ls_move)
    o_ref[...] = (t * scale + shift).astype(o_ref.dtype)


# --------------------------------------------------------------------------- #
# Host-side parameter preparation (done once, outside the hot path)
# --------------------------------------------------------------------------- #
def bhvit_self_output_prepare(w, b, move, gamma, beta, move1, prelu_w, move2,
                              ls_alpha, ls_move, *, weight_dtype=jnp.bfloat16):
    """Fold adjacent per-channel affines and pre-transpose/cast the weight.

    w: PyTorch Linear weight, shape (H_out, H_in) = (H, H).  Returns:
      w_t    : (H_in, H_out) in `weight_dtype`  (so y = x @ w_t)
      params : (8, H) f32 packed per-channel parameter block
    """
    f32 = jnp.float32
    H = w.shape[0]
    w_t32 = jnp.transpose(w.astype(f32))                       # (H_in, H_out)

    b_eff    = b.astype(f32) + move.astype(f32) @ w_t32        # (x+move)W^T = xW^T + moveW^T
    beta_eff = beta.astype(f32) - move1.astype(f32)
    scale    = ls_alpha.astype(f32)
    shift    = move2.astype(f32) * scale + ls_move.astype(f32)

    rows = [b_eff, gamma.astype(f32), beta_eff, prelu_w.astype(f32), scale, shift]
    rows += [jnp.zeros((H,), f32)] * (8 - len(rows))            # pad to 8 sublanes
    params = jnp.stack(rows, axis=0)                            # (8, H)
    return w_t32.astype(weight_dtype), params


# --------------------------------------------------------------------------- #
# Wrapper
# --------------------------------------------------------------------------- #
def _round_up(x, m):
    return ((x + m - 1) // m) * m


def bhvit_self_output(hidden_states, w_t, params, *, eps=1e-5, block_rows=256):
    """Fused BHViTSelfOutput.forward (eval mode).

    hidden_states: (..., H).   w_t: (H_in, H_out) pre-transposed weight (bf16).
    params: (8, H) f32 packed block from `bhvit_self_output_prepare`.
    """
    orig_shape = hidden_states.shape
    H = orig_shape[-1]
    x2d = hidden_states.reshape(-1, H)                          # lane-dense slab
    M = x2d.shape[0]
    act_bytes = x2d.dtype.itemsize

    # ---- row tile: fixed, sublane-aligned, shrunk only if VMEM budget demands it
    tm = min(block_rows, _round_up(M, 8))
    tm = max(8, (tm // 8) * 8)

    def _need_bytes(tm_):
        w_buf = 2 * H * H * w_t.dtype.itemsize        # conservative (covers fallback)
        io = 2 * tm_ * H * act_bytes * 2               # double-buffered in + out tiles
        p = 2 * 8 * H * 4
        tmp = 4 * tm_ * H * 4                          # f32 intermediates headroom
        return w_buf + io + p + tmp

    VMEM_BUDGET = 40 * 1024 * 1024                     # safe across v5e/v6e/v7x
    while tm > 8 and _need_bytes(tm) > VMEM_BUDGET:
        tm = max(8, ((tm // 2) // 8) * 8)

    grid = (pl.cdiv(M, tm),)                           # ragged last block handled by Pallas
    vmem_limit = int(min(max(_need_bytes(tm) + (8 << 20), 32 << 20), 48 << 20))

    x_spec = pl.BlockSpec((tm, H), lambda i: (i, 0))
    p_spec = pl.BlockSpec((8, H), lambda i: (0, 0))
    out_spec = pl.BlockSpec((tm, H), lambda i: (i, 0))

    cost = pl.CostEstimate(
        flops=int(2 * M * H * H + 10 * M * H),
        transcendentals=int(M),
        bytes_accessed=int(2 * M * H * act_bytes + H * H * w_t.dtype.itemsize
                           + 8 * H * 4),
    )
    kernel = functools.partial(_self_output_kernel, eps=float(eps))

    def _make_call(single_buffer_weight):
        if single_buffer_weight:
            # Constant index_map -> weight is fetched once; single-buffer it so it
            # doesn't burn 2x its size in VMEM.
            w_spec = pl.BlockSpec((H, H), lambda i: (0, 0),
                                  pipeline_mode=pl.Buffered(1))
        else:
            w_spec = pl.BlockSpec((H, H), lambda i: (0, 0))
        return pl.pallas_call(
            kernel,
            out_shape=jax.ShapeDtypeStruct((M, H), hidden_states.dtype),
            grid=grid,
            in_specs=[x_spec, w_spec, p_spec],
            out_specs=out_spec,
            compiler_params=pltpu.CompilerParams(
                dimension_semantics=("parallel",),
                vmem_limit_bytes=vmem_limit,
            ),
            cost_estimate=cost,
        )

    try:
        out2d = _make_call(True)(x2d, w_t, params)
    except Exception:
        # Fallback: default double-buffering of the weight block.
        out2d = _make_call(False)(x2d, w_t, params)

    return out2d.reshape(orig_shape)


# --------------------------------------------------------------------------- #
# Pure-JAX reference (f32, un-folded) for verification
# --------------------------------------------------------------------------- #
def _reference(x, w, b, move, gamma, beta, move1, prelu_w, move2,
               ls_alpha, ls_move, eps):
    z = x + move
    d = jnp.einsum('...i,oi->...o', z, w) + b
    mean = d.mean(-1, keepdims=True)
    var = ((d - mean) ** 2).mean(-1, keepdims=True)
    n = (d - mean) / jnp.sqrt(var + eps) * gamma + beta
    o = n + x
    t = o - move1
    t = jnp.where(t >= 0, t, prelu_w * t)
    o = t + move2
    return o * ls_alpha + ls_move


if __name__ == "__main__":
    key = jax.random.PRNGKey(0)
    B, N, H = 2, 13, 32   # batch, seq, hidden (seq chosen so the last block is ragged)
    ks = jax.random.split(key, 12)

    x = jax.random.normal(ks[0], (B, N, H), dtype=jnp.float32)
    w = jax.random.normal(ks[1], (H, H), dtype=jnp.float32) * 0.1   # PyTorch (out, in)
    b = jax.random.normal(ks[2], (H,), dtype=jnp.float32) * 0.1
    move = jax.random.normal(ks[3], (H,), dtype=jnp.float32) * 0.1
    gamma = 1.0 + jax.random.normal(ks[4], (H,), dtype=jnp.float32) * 0.05
    beta = jax.random.normal(ks[5], (H,), dtype=jnp.float32) * 0.05
    move1 = jax.random.normal(ks[6], (H,), dtype=jnp.float32) * 0.1
    prelu_w = 0.25 + jax.random.normal(ks[7], (H,), dtype=jnp.float32) * 0.05
    move2 = jax.random.normal(ks[8], (H,), dtype=jnp.float32) * 0.1
    ls_alpha = 0.1 + jax.random.normal(ks[9], (H,), dtype=jnp.float32) * 0.01
    ls_move = jax.random.normal(ks[10], (H,), dtype=jnp.float32) * 0.01
    eps = 1e-5   # PyTorch nn.LayerNorm default

    # One-time parameter preparation (transpose, bf16 cast, affine folding).
    w_t, params = bhvit_self_output_prepare(w, b, move, gamma, beta, move1,
                                            prelu_w, move2, ls_alpha, ls_move)

    # block_rows=8 -> grid of 4 steps over 26 tokens (exercises pipelining + ragged tail).
    out = bhvit_self_output(x, w_t, params, eps=eps, block_rows=8)
    out = jax.block_until_ready(out)

    ref = _reference(x, w, b, move, gamma, beta, move1, prelu_w, move2,
                     ls_alpha, ls_move, eps)

    # bf16 MXU operands with f32 accumulation -> loosen tolerances accordingly.
    if np.allclose(np.asarray(out), np.asarray(ref), atol=2e-2, rtol=2e-2):
        print("KERNEL_OK")
    else:
        err = float(np.max(np.abs(np.asarray(out) - np.asarray(ref))))
        print(f"MISMATCH max_abs_err={err}")
</pallas_src>

<mosaic_0001>
module attributes {stable_mosaic.version = 11 : i64} {
  func.func @_self_output_kernel(%arg0: i32, %arg1: memref<8x32xf32, #tpu.memory_space<vmem>>, %arg2: memref<32x32xbf16, #tpu.memory_space<vmem>>, %arg3: memref<8x32xf32, #tpu.memory_space<vmem>>, %arg4: memref<8x32xf32, #tpu.memory_space<vmem>>) attributes {dimension_semantics = [#tpu.dimension_semantics<parallel>], iteration_bounds = array<i64: 4>, scalar_prefetch = 0 : i64, scratch_operands = 0 : i64, tpu.core_type = #tpu.core_type<tc>, window_params = [{transform_indices = @transform_0, window_bounds = array<i64: 8, 32>}, {pipeline_mode = #tpu.pipeline_mode<synchronous>, transform_indices = @transform_1, window_bounds = array<i64: 32, 32>}, {pipeline_mode = #tpu.pipeline_mode<synchronous>, transform_indices = @transform_2, window_bounds = array<i64: 8, 32>}, {transform_indices = @transform_3, window_bounds = array<i64: 8, 32>}]} {
    %c0 = arith.constant 0 : index
    %c0_0 = arith.constant 0 : index
    %0 = vector.load %arg1[%c0, %c0_0] : memref<8x32xf32, #tpu.memory_space<vmem>>, vector<8x32xf32>
    %c0_1 = arith.constant 0 : index
    %c0_2 = arith.constant 0 : index
    %1 = vector.load %arg3[%c0_1, %c0_2] : memref<8x32xf32, #tpu.memory_space<vmem>>, vector<1x32xf32>
    %c1 = arith.constant 1 : index
    %c0_3 = arith.constant 0 : index
    %2 = vector.load %arg3[%c1, %c0_3] : memref<8x32xf32, #tpu.memory_space<vmem>>, vector<1x32xf32>
    %c2 = arith.constant 2 : index
    %c0_4 = arith.constant 0 : index
    %3 = vector.load %arg3[%c2, %c0_4] : memref<8x32xf32, #tpu.memory_space<vmem>>, vector<1x32xf32>
    %c3 = arith.constant 3 : index
    %c0_5 = arith.constant 0 : index
    %4 = vector.load %arg3[%c3, %c0_5] : memref<8x32xf32, #tpu.memory_space<vmem>>, vector<1x32xf32>
    %c4 = arith.constant 4 : index
    %c0_6 = arith.constant 0 : index
    %5 = vector.load %arg3[%c4, %c0_6] : memref<8x32xf32, #tpu.memory_space<vmem>>, vector<1x32xf32>
    %c5 = arith.constant 5 : index
    %c0_7 = arith.constant 0 : index
    %6 = vector.load %arg3[%c5, %c0_7] : memref<8x32xf32, #tpu.memory_space<vmem>>, vector<1x32xf32>
    %c0_8 = arith.constant 0 : index
    %c0_9 = arith.constant 0 : index
    %7 = vector.load %arg1[%c0_8, %c0_9] : memref<8x32xf32, #tpu.memory_space<vmem>>, vector<8x32xf32>
    %8 = arith.truncf %7 : vector<8x32xf32> to vector<8x32xbf16>
    %c0_10 = arith.constant 0 : index
    %c0_11 = arith.constant 0 : index
    %9 = vector.load %arg2[%c0_10, %c0_11] : memref<32x32xbf16, #tpu.memory_space<vmem>>, vector<32x32xbf16>
    %cst = arith.constant dense<0.000000e+00> : vector<8x32xf32>
    %10 = tpu.matmul %8, %9, %cst {dimension_numbers = #tpu.dot_dimension_numbers<[1], [0], [0], [1], [0, 0, 1, 1], [], []>} : vector<8x32xbf16>, vector<32x32xbf16>, vector<8x32xf32> -> vector<8x32xf32>
    %11 = vector.broadcast %1 : vector<1x32xf32> to vector<8x32xf32>
    %12 = arith.addf %10, %11 : vector<8x32xf32>
    %cst_12 = arith.constant dense<0.000000e+00> : vector<8xf32>
    %13 = vector.multi_reduction <add>, %12, %cst_12 [1] : vector<8x32xf32> to vector<8xf32>
    %14 = vector.shape_cast %13 : vector<8xf32> to vector<8x1xf32>
    %cst_13 = arith.constant 3.200000e+01 : f32
    %15 = vector.broadcast %cst_13 : f32 to vector<8x1xf32>
    %16 = arith.divf %14, %15 : vector<8x1xf32>
    %17 = vector.broadcast %16 : vector<8x1xf32> to vector<8x32xf32>
    %18 = arith.subf %12, %17 : vector<8x32xf32>
    %19 = arith.mulf %18, %18 : vector<8x32xf32>
    %cst_14 = arith.constant dense<0.000000e+00> : vector<8xf32>
    %20 = vector.multi_reduction <add>, %19, %cst_14 [1] : vector<8x32xf32> to vector<8xf32>
    %21 = vector.shape_cast %20 : vector<8xf32> to vector<8x1xf32>
    %cst_15 = arith.constant 3.200000e+01 : f32
    %22 = vector.broadcast %cst_15 : f32 to vector<8x1xf32>
    %23 = arith.divf %21, %22 : vector<8x1xf32>
    %cst_16 = arith.constant 9.99999974E-6 : f32
    %24 = vector.broadcast %cst_16 : f32 to vector<8x1xf32>
    %25 = arith.addf %23, %24 : vector<8x1xf32>
    %26 = math.rsqrt %25 : vector<8x1xf32>
    %27 = vector.broadcast %26 : vector<8x1xf32> to vector<8x32xf32>
    %28 = arith.mulf %18, %27 : vector<8x32xf32>
    %29 = vector.broadcast %2 : vector<1x32xf32> to vector<8x32xf32>
    %30 = arith.mulf %28, %29 : vector<8x32xf32>
    %31 = vector.broadcast %3 : vector<1x32xf32> to vector<8x32xf32>
    %32 = arith.addf %30, %31 : vector<8x32xf32>
    %33 = arith.addf %32, %0 : vector<8x32xf32>
    %cst_17 = arith.constant 0.000000e+00 : f32
    %34 = vector.broadcast %cst_17 : f32 to vector<8x32xf32>
    %35 = arith.cmpf oge, %33, %34 : vector<8x32xf32>
    %36 = vector.broadcast %4 : vector<1x32xf32> to vector<8x32xf32>
    %37 = arith.mulf %36, %33 : vector<8x32xf32>
    %38 = arith.select %35, %33, %37 : vector<8x32xi1>, vector<8x32xf32>
    %39 = vector.broadcast %5 : vector<1x32xf32> to vector<8x32xf32>
    %40 = arith.mulf %38, %39 : vector<8x32xf32>
    %41 = vector.broadcast %6 : vector<1x32xf32> to vector<8x32xf32>
    %42 = arith.addf %40, %41 : vector<8x32xf32>
    %c0_18 = arith.constant 0 : index
    %c0_19 = arith.constant 0 : index
    %43 = vector.load %arg4[%c0_18, %c0_19] : memref<8x32xf32, #tpu.memory_space<vmem>>, vector<8x32xf32>
    tpu.vector_store %arg4[%c0_18, %c0_19], %42 {strides = array<i32>} : memref<8x32xf32, #tpu.memory_space<vmem>>, vector<8x32xf32>,
    return
  }
  func.func @transform_0(%arg0: i32) -> (i32, i32) {
    %c0_i32 = arith.constant 0 : i32
    %c0_i32_0 = arith.constant 0 : i32
    return %arg0, %c0_i32 : i32, i32
  }
  func.func @transform_1(%arg0: i32) -> (i32, i32) {
    %c0_i32 = arith.constant 0 : i32
    %c0_i32_0 = arith.constant 0 : i32
    %c0_i32_1 = arith.constant 0 : i32
    return %c0_i32, %c0_i32_0 : i32, i32
  }
  func.func @transform_2(%arg0: i32) -> (i32, i32) {
    %c0_i32 = arith.constant 0 : i32
    %c0_i32_0 = arith.constant 0 : i32
    %c0_i32_1 = arith.constant 0 : i32
    return %c0_i32, %c0_i32_0 : i32, i32
  }
  func.func @transform_3(%arg0: i32) -> (i32, i32) {
    %c0_i32 = arith.constant 0 : i32
    %c0_i32_0 = arith.constant 0 : i32
    return %arg0, %c0_i32 : i32, i32
  }
}

module attributes {stable_mosaic.version = 11 : i64} {
  func.func @_self_output_kernel(%arg0: i32, %arg1: memref<8x32xf32, #tpu.memory_space<vmem>>, %arg2: memref<32x32xbf16, #tpu.memory_space<vmem>>, %arg3: memref<8x32xf32, #tpu.memory_space<vmem>>, %arg4: memref<8x32xf32, #tpu.memory_space<vmem>>) attributes {dimension_semantics = [#tpu.dimension_semantics<parallel>], iteration_bounds = array<i64: 4>, scalar_prefetch = 0 : i64, scratch_operands = 0 : i64, tpu.core_type = #tpu.core_type<tc>, window_params = [{transform_indices = @transform_0, window_bounds = array<i64: 8, 32>}, {pipeline_mode = #tpu.pipeline_mode<synchronous>, transform_indices = @transform_1, window_bounds = array<i64: 32, 32>}, {pipeline_mode = #tpu.pipeline_mode<synchronous>, transform_indices = @transform_2, window_bounds = array<i64: 8, 32>}, {transform_indices = @transform_3, window_bounds = array<i64: 8, 32>}]} {
    %c0 = arith.constant 0 : index
    %c0_0 = arith.constant 0 : index
    %0 = vector.load %arg1[%c0, %c0_0] : memref<8x32xf32, #tpu.memory_space<vmem>>, vector<8x32xf32>
    %c0_1 = arith.constant 0 : index
    %c0_2 = arith.constant 0 : index
    %1 = vector.load %arg3[%c0_1, %c0_2] : memref<8x32xf32, #tpu.memory_space<vmem>>, vector<1x32xf32>
    %c1 = arith.constant 1 : index
    %c0_3 = arith.constant 0 : index
    %2 = vector.load %arg3[%c1, %c0_3] : memref<8x32xf32, #tpu.memory_space<vmem>>, vector<1x32xf32>
    %c2 = arith.constant 2 : index
    %c0_4 = arith.constant 0 : index
    %3 = vector.load %arg3[%c2, %c0_4] : memref<8x32xf32, #tpu.memory_space<vmem>>, vector<1x32xf32>
    %c3 = arith.constant 3 : index
    %c0_5 = arith.constant 0 : index
    %4 = vector.load %arg3[%c3, %c0_5] : memref<8x32xf32, #tpu.memory_space<vmem>>, vector<1x32xf32>
    %c4 = arith.constant 4 : index
    %c0_6 = arith.constant 0 : index
    %5 = vector.load %arg3[%c4, %c0_6] : memref<8x32xf32, #tpu.memory_space<vmem>>, vector<1x32xf32>
    %c5 = arith.constant 5 : index
    %c0_7 = arith.constant 0 : index
    %6 = vector.load %arg3[%c5, %c0_7] : memref<8x32xf32, #tpu.memory_space<vmem>>, vector<1x32xf32>
    %c0_8 = arith.constant 0 : index
    %c0_9 = arith.constant 0 : index
    %7 = vector.load %arg1[%c0_8, %c0_9] : memref<8x32xf32, #tpu.memory_space<vmem>>, vector<8x32xf32>
    %8 = arith.truncf %7 : vector<8x32xf32> to vector<8x32xbf16>
    %c0_10 = arith.constant 0 : index
    %c0_11 = arith.constant 0 : index
    %9 = vector.load %arg2[%c0_10, %c0_11] : memref<32x32xbf16, #tpu.memory_space<vmem>>, vector<32x32xbf16>
    %cst = arith.constant dense<0.000000e+00> : vector<8x32xf32>
    %10 = tpu.matmul %8, %9, %cst {dimension_numbers = #tpu.dot_dimension_numbers<[1], [0], [0], [1], [0, 0, 1, 1], [], []>} : vector<8x32xbf16>, vector<32x32xbf16>, vector<8x32xf32> -> vector<8x32xf32>
    %11 = vector.broadcast %1 : vector<1x32xf32> to vector<8x32xf32>
    %12 = arith.addf %10, %11 : vector<8x32xf32>
    %cst_12 = arith.constant dense<0.000000e+00> : vector<8xf32>
    %13 = vector.multi_reduction <add>, %12, %cst_12 [1] : vector<8x32xf32> to vector<8xf32>
    %14 = vector.shape_cast %13 : vector<8xf32> to vector<8x1xf32>
    %cst_13 = arith.constant 3.200000e+01 : f32
    %15 = vector.broadcast %cst_13 : f32 to vector<8x1xf32>
    %16 = arith.divf %14, %15 : vector<8x1xf32>
    %17 = vector.broadcast %16 : vector<8x1xf32> to vector<8x32xf32>
    %18 = arith.subf %12, %17 : vector<8x32xf32>
    %19 = arith.mulf %18, %18 : vector<8x32xf32>
    %cst_14 = arith.constant dense<0.000000e+00> : vector<8xf32>
    %20 = vector.multi_reduction <add>, %19, %cst_14 [1] : vector<8x32xf32> to vector<8xf32>
    %21 = vector.shape_cast %20 : vector<8xf32> to vector<8x1xf32>
    %cst_15 = arith.constant 3.200000e+01 : f32
    %22 = vector.broadcast %cst_15 : f32 to vector<8x1xf32>
    %23 = arith.divf %21, %22 : vector<8x1xf32>
    %cst_16 = arith.constant 9.99999974E-6 : f32
    %24 = vector.broadcast %cst_16 : f32 to vector<8x1xf32>
    %25 = arith.addf %23, %24 : vector<8x1xf32>
    %26 = math.rsqrt %25 : vector<8x1xf32>
    %27 = vector.broadcast %26 : vector<8x1xf32> to vector<8x32xf32>
    %28 = arith.mulf %18, %27 : vector<8x32xf32>
    %29 = vector.broadcast %2 : vector<1x32xf32> to vector<8x32xf32>
    %30 = arith.mulf %28, %29 : vector<8x32xf32>
    %31 = vector.broadcast %3 : vector<1x32xf32> to vector<8x32xf32>
    %32 = arith.addf %30, %31 : vector<8x32xf32>
    %33 = arith.addf %32, %0 : vector<8x32xf32>
    %cst_17 = arith.constant 0.000000e+00 : f32
    %34 = vector.broadcast %cst_17 : f32 to vector<8x32xf32>
    %35 = arith.cmpf oge, %33, %34 : vector<8x32xf32>
    %36 = vector.broadcast %4 : vector<1x32xf32> to vector<8x32xf32>
    %37 = arith.mulf %36, %33 : vector<8x32xf32>
    %38 = arith.select %35, %33, %37 : vector<8x32xi1>, vector<8x32xf32>
    %39 = vector.broadcast %5 : vector<1x32xf32> to vector<8x32xf32>
    %40 = arith.mulf %38, %39 : vector<8x32xf32>
    %41 = vector.broadcast %6 : vector<1x32xf32> to vector<8x32xf32>
    %42 = arith.addf %40, %41 : vector<8x32xf32>
    %c0_18 = arith.constant 0 : index
    %c0_19 = arith.constant 0 : index
    %43 = vector.load %arg4[%c0_18, %c0_19] : memref<8x32xf32, #tpu.memory_space<vmem>>, vector<8x32xf32>
    tpu.vector_store %arg4[%c0_18, %c0_19], %42 {strides = array<i32>} : memref<8x32xf32, #tpu.memory_space<vmem>>, vector<8x32xf32>,
    return
  }
  func.func @transform_0(%arg0: i32) -> (i32, i32) {
    %c0_i32 = arith.constant 0 : i32
    %c0_i32_0 = arith.constant 0 : i32
    return %arg0, %c0_i32 : i32, i32
  }
  func.func @transform_1(%arg0: i32) -> (i32, i32) {
    %c0_i32 = arith.constant 0 : i32
    %c0_i32_0 = arith.constant 0 : i32
    %c0_i32_1 = arith.constant 0 : i32
    return %c0_i32, %c0_i32_0 : i32, i32
  }
  func.func @transform_2(%arg0: i32) -> (i32, i32) {
    %c0_i32 = arith.constant 0 : i32
    %c0_i32_0 = arith.constant 0 : i32
    %c0_i32_1 = arith.constant 0 : i32
    return %c0_i32, %c0_i32_0 : i32, i32
  }
  func.func @transform_3(%arg0: i32) -> (i32, i32) {
    %c0_i32 = arith.constant 0 : i32
    %c0_i32_0 = arith.constant 0 : i32
    return %arg0, %c0_i32 : i32, i32
  }
}

</mosaic_0001>

<bundles_post_ra>
// kernel: tpu_custom_call.1
= control target key start
LH: loop header
LB: loop body
LE: loop exit
PB: predicated region body
PF: predicated region fallthrough
CT: control target
= control target key end

     0   :  { %8 = vsyncpa [#allocation3], 0  ;;  %s957_s0 = inlined_call_operand.hbm [shape: f32[26,32], index: 0, kind: input, shape index: {}]   ;;  %s958_s1 = inlined_call_operand.hbm [shape: bf16[32,32], index: 1, kind: input, shape index: {}]   ;;  %s959_s2 = inlined_call_operand.hbm [shape: f32[8,32], index: 2, kind: input, shape index: {}]   ;;  %s960_s3 = inlined_call_operand.hbm [shape: f32[26,32], index: 3, kind: output, shape index: {}]  }
   0x1   :  { %10 = vsyncpa [#allocation3 + $0x1], 0 }
   0x2   :  { %11 = vsyncpa [#allocation6], 0 }
   0x3   :  { %12 = vsyncpa [#allocation4], 0 }
   0x4   :  { %14 = vsyncpa [#allocation4 + $0x1], 0  ;;  %s729_s12 = smov 0   ;;  %s731_s13 = smov 0  }
   0x5   :  { %s733_s14 = smov 0   ;;  %s735_s15 = smov 0  }
   0x6 LB: > { %s750_s16 = sadd.s32 4294967295, %s699_s15   ;;  %s432_s17 = sadd.s32 4294967294, %s699_s15   ;;  %s699_s15 = sphi %s735_s15, %s979_s15   ;;  %s695_s14 = sphi %s733_s14, %s978_s14   ;;  %s691_s13 = sphi %s731_s13, %s977_s13   ;;  %s687_s12 = sphi %s729_s12, %s976_s12  }
   0x7   : > { %p40_p0 = scmp.ne.s32.totalorder %s691_s13, %s687_s12  ;;  %p961_p1 = scmp.eq.s32.totalorder %s750_s16, 0 }
   0x8   : > { %p112_p3 = scmp.eq.s32.totalorder %s432_s17, 3  ;;  %p433_p5 = scmp.ge.s32.totalorder %s699_s15, 1 }
   0x9   : > { %p759_p4 = por %p961_p1, %p40_p0  ;;  %p119_p7 = scmp.lt.s32.totalorder %s699_s15, 5 }
   0xa   : > { %p764_p6 = por %p112_p3, %p40_p0  ;;  %s701_s21 = smov [#allocation5]  }
   0xb   : > { %s964_s18 = scalar_select %p759_p4, 1, 0 }
   0xc   : > { %s965_s19 = scalar_select %p764_p6, 1, 0 }
   0xd   : > { %p769_p8 = pnand %p433_p5, %p119_p7  ;;  %s131_s22 = sshll.u32 %s701_s21, 4  ;;  %s132_s22 = int_to_ptr.vmem [resolvable:$true] %s131_s22 }
   0xe   : > { %s702_s24 = smov [#allocation7]   ;;  %s543_s28 = scalar_lea.hbm %s958_s1, 256 }
   0xf   : > { %s966_s20 = scalar_select %p769_p8, 1, 0 }
  0x10   : > { %p480_p9 = pneg %p769_p8  ;;  %s145_s25 = sshll.u32 %s702_s24, 4  ;;  %s781_s25 = int_to_ptr.vmem [resolvable:$true] %s145_s25 }
  0x11   : > { %p544_p11 = scmp.ne.s32.totalorder %s958_s1, %s543_s28  ;;  %p550_p3 = scmp.lt.u32.totalorder %s543_s28, %s958_s1 }
  0x12   : > { %p777_p10 = pnand %p480_p9, %p961_p1 }
  0x14   : > { %p545_p12 = pneg %p777_p10 }
  0x16   : > { %p546_p13 = pnand %p545_p12, %p544_p11 }
  0x18   : > { %p547_p0 = pneg %p546_p13 }
  0x1a   : > { %p552_p5 = pnand %p550_p3, %p547_p0 }
  0x1c   : > { %555 = shalt.err (!%p552_p5)
}
  0x1d   : > { %s556_s6 = scalar_lea.vmem %s132_s22, 256  ;;  %p564_p2 = scmp.lt.s32.totalorder %s132_s22, %s132_s22 }
  0x1e   : > { %p557_p7 = scmp.ne.s32.totalorder %s132_s22, %s556_s6  ;;  %p565_p6 = scmp.lt.s32.totalorder %s556_s6, %s556_s6 }
  0x20   : > { %p559_p9 = pnand %p557_p7, %p545_p12  ;;  %p566_p4 = por %p565_p6, %p564_p2 }
  0x22   : > { %p560_p1 = pneg %p559_p9 }
  0x24   : > { %p567_p8 = pnand %p566_p4, %p560_p1 }
  0x26   : > { %570 = shalt.err (!%p567_p8)
}
  0x27   : > { %s703_s7 = smov 64   ;;  %s704_s8 = smov 4  }
  0x28   : > { %483 = dma.hbm_to_vmem [thread:$0]  (!%p777_p10), %s958_s1, 256, %s132_s22, [#allocation6], %s703_s7, %s703_s7, %s704_s8  }
  0x29   : > { %s571_s21 = scalar_lea.hbm %s959_s2, 128 }
  0x2a   : > { %p572_p11 = scmp.ne.s32.totalorder %s959_s2, %s571_s21  ;;  %p578_p4 = scmp.lt.u32.totalorder %s571_s21, %s959_s2 }
  0x2c   : > { %p574_p1 = pnand %p572_p11, %p545_p12 }
  0x2e   : > { %p575_p2 = pneg %p574_p1 }
  0x30   : > { %p580_p6 = pnand %p578_p4, %p575_p2 }
  0x32   : > { %583 = shalt.err (!%p580_p6)
}
  0x33   : > { %s584_s22 = scalar_lea.vmem %s781_s25, 128  ;;  %p592_p3 = scmp.lt.s32.totalorder %s781_s25, %s781_s25 }
  0x34   : > { %p585_p8 = scmp.ne.s32.totalorder %s781_s25, %s584_s22  ;;  %p593_p5 = scmp.lt.s32.totalorder %s584_s22, %s584_s22 }
  0x36   : > { %p587_p13 = pnand %p585_p8, %p545_p12  ;;  %p594_p7 = por %p593_p5, %p592_p3 }
  0x38   : > { %p588_p0 = pneg %p587_p13 }
  0x3a   : > { %p595_p9 = pnand %p594_p7, %p588_p0 }
  0x3c   : > { %598 = shalt.err (!%p595_p9)
}
  0x3d   : > { %486 = dma.hbm_to_vmem [thread:$0]  (!%p777_p10), %s959_s2, 128, %s781_s25, [#allocation6]  }
  0x3e   : > { %s831_s4 = sadd.s32 1, %s699_s15   ;;  %s27_s23 = sadd.s32 1, %s695_s14 }
  0x3f   : > { %s24_s5 = ssub.s32 %s699_s15, %s831_s4  ;;  %p34_p12 = scmp.ne.s32.totalorder %s695_s14, %s691_s13 }
  0x40   : > { %p25_p11 = scmp.eq.s32.totalorder %s24_s5, 0  ;;  %p35_p1 = scmp.eq.s32.totalorder %s699_s15, 0 }
  0x41   : > { %p968_p2 = scmp.eq.s32.totalorder %s750_s16, 3  ;;  %p497_p6 = scmp.lt.s32.totalorder %s699_s15, 4 }
  0x42   : > { %s847_s7 = scalar_select %p25_p11, %s695_s14, %s27_s23  }
  0x43   : > { %p841_p4 = por %p968_p2, %p34_p12  ;;  %p36_p8 = por %p35_p1, %p34_p12 }
  0x44   : > { %s156_s8 = sand.u32 1, %s695_s14   ;;  %s438_s25 = sshll.u32 %s699_s15, 7 }
  0x45   : > { %s437_s9 = sshll.u32 %s156_s8, 3  ;;  %s854_s17 = scalar_lea.hbm %s957_s0, %s438_s25 }
  0x46   : > { %s160_s21 = scalar_lea.vmem [#allocation2], %s437_s9  ;;  %p858_p10 = pnand %p497_p6, %p36_p8 }
  0x47   : > { %s167_s24 = sshll.u32 %s160_s21, 4  ;;  %s157_s27 = scalar_lea.sflag [#allocation3], %s156_s8  ;;  %s856_s24 = int_to_ptr.vmem [resolvable:$true] %s167_s24 }
  0x48   : > { %s599_s28 = scalar_lea.hbm %s854_s17, 128  ;;  %p601_p0 = pneg %p858_p10 }
  0x49   : > { %p600_p13 = scmp.ne.s32.totalorder %s854_s17, %s599_s28  ;;  %s604_s30 = scalar_lea.hbm %s957_s0, 512 }
  0x4a   : > { %p605_p7 = scmp.lt.u32.totalorder %s854_s17, %s957_s0  ;;  %p606_p9 = scmp.lt.u32.totalorder %s604_s30, %s599_s28 }
  0x4b   : > { %p602_p3 = pnand %p601_p0, %p600_p13  ;;  %p608_p11 = scmp.lt.u32.totalorder %s599_s28, %s854_s17 }
  0x4c   : > { %p607_p12 = por %p606_p9, %p605_p7 }
  0x4d   : > { %p603_p5 = pneg %p602_p3 }
  0x4e   : > { %p609_p1 = por %p608_p11, %p607_p12 }
  0x50   : > { %p610_p2 = pnand %p609_p1, %p603_p5 }
  0x52   : > { %613 = shalt.err (!%p610_p2)
}
  0x53   : > { %s614_s8 = scalar_lea.vmem %s856_s24, 128  ;;  %s705_s9 = smov [#allocation2]  }
  0x54   : > { %p615_p6 = scmp.ne.s32.totalorder %s856_s24, %s614_s8  ;;  %s619_s25 = sshll.u32 %s705_s9, 4  ;;  %s620_s25 = int_to_ptr.vmem [resolvable:$false] %s619_s25 }
  0x55   : > { %s621_s10 = scalar_lea.vmem %s620_s25, 256  ;;  %p622_p3 = scmp.lt.s32.totalorder %s856_s24, %s620_s25 }
  0x56   : > { %p617_p8 = pnand %p615_p6, %p601_p0  ;;  %p623_p7 = scmp.lt.s32.totalorder %s621_s10, %s614_s8 }
  0x58   : > { %p618_p13 = pneg %p617_p8  ;;  %p624_p9 = por %p623_p7, %p622_p3 }
  0x5a   : > { %p625_p12 = pnand %p624_p9, %p618_p13 }
  0x5c   : > { %628 = shalt.err (!%p625_p12)
}
  0x5d   : > { %490 = dma.hbm_to_vmem [thread:$0]  (!%p858_p10), %s854_s17, 128, %s856_s24, %s157_s27  }
  0x5e   : > { %p971_p5 = scmp.ne.s32.totalorder %s966_s20, 0 }
  0x5f   : > { %s890_s11 = sand.u32 (!%p971_p5), 1, %s691_s13   ;;  %p972_p0 = scmp.ne.s32.totalorder (!%p971_p5), %s964_s18, 0 }
  0x60   : > { %176 = sbr.rel (%p971_p5) target bundleno = 666 (0x29a), region = 32  ;;  %s440_s21 = sshll.u32 (!%p971_p5), %s890_s11, 3 }
  0x61   : > { %s179_s28 = scalar_lea.sflag (!%p971_p5), [#allocation3], %s890_s11  ;;  %s182_s22 = scalar_lea.vmem (!%p971_p5), [#allocation2], %s440_s21 }
  0x67   : > { %674 = dma.done.wait (%p972_p0), %s179_s28, 128  }
  0x68   : > { %676 = vsyncadd (%p972_p0), %s179_s28, 4294967168  ;;  %p973_p10 = scmp.eq.s32.totalorder %s750_s16, 0 }
  0x6a   : > { %678 = dma.done.wait (%p973_p10), [#allocation6], 384   ;;  %p974_p11 = pmov %p973_p10 }
  0x6b   : > { %v706_v0 = vmov 0.0   ;;  %vm707_vm0 = vmmov 0   ;;  %v539_v1 = vld [vmem:[#allocation5] sm:$0xff]   ;;  %v540_v2 = vld [vmem:[#allocation5 + $0x8] sm:$0xff]   ;;  %v214_v3 = vld [vmem:[%s182_s22] sm:$0xff]  ;;  %vm242_vm1 = vcmask 261120  }
  0x6c   : > { %680 = vsyncadd (%p974_p11), [#allocation6], 4294966912  ;;  %460 = vmatprep.subr.bf16.mxu0 %v706_v0  ;;  %464 = vmatprep.mubr.msk.bf16.mxu0 %vm707_vm0, %v706_v0  ;;  %v221_v4 = vpack.c.bf16 %v214_v3, %v214_v3  ;;  %v444_v5 = vld [vmem:[#allocation7] ss:$0 sm:$0xff]  ;;  %v448_v21 = vld [vmem:[#allocation7 + $0x1] ss:$0 sm:$0xff] }
  0x6d   : > { %461 = vmatpush3.bf16.msra.mxu0 %v539_v1  ;;  %v449_v23 = vld [vmem:[#allocation7 + $0x2] ss:$0 sm:$0xff]  ;;  %v450_v26 = vld [vmem:[#allocation7 + $0x3] ss:$0 sm:$0xff]  ;;  %v451_v28 = vld [vmem:[#allocation7 + $0x4] ss:$0 sm:$0xff] }
  0x6e   : > { %462 = vmatprep.subr.bf16.mxu0 %v706_v0  ;;  %v452_v30 = vld [vmem:[#allocation7 + $0x5] ss:$0 sm:$0xff]  ;;  %s454_s18 = sshll.u32 %s750_s16, 7  ;;  %s212_s20 = scalar_lea.vmem [#allocation8], %s440_s21 }
  0x6f   : > { %s343_s17 = sshll.u32 %s212_s20, 4  ;;  %s913_s27 = scalar_lea.hbm %s960_s3, %s454_s18  ;;  %s915_s17 = int_to_ptr.vmem [resolvable:$true] %s343_s17 }
  0x70   : > { %s330_s29 = scalar_lea.sflag [#allocation4], %s890_s11  ;;  %s629_s30 = scalar_lea.vmem %s915_s17, 128 }
  0x71   : > { %463 = vmatpush3.bf16.msra.mxu0 %v540_v2  ;;  %p630_p1 = scmp.ne.s32.totalorder %s915_s17, %s629_s30  ;;  %s708_s16 = smov [#allocation8]  }
  0x72   : > { %s633_s23 = sshll.u32 %s708_s16, 4  ;;  %s634_s23 = int_to_ptr.vmem [resolvable:$false] %s633_s23 }
  0x73   : > { %p631_p2 = pnand %p630_p1, %p841_p4  ;;  %s635_s5 = scalar_lea.vmem %s634_s23, 256 }
  0x74   : > { %465 = vmatmul.mubr.msk.bf16.vlgmr.msra.gmra.mrb[0].mxu0 %vm242_vm1, %v221_v4  ;;  %p636_p8 = scmp.lt.s32.totalorder %s915_s17, %s634_s23  ;;  %p637_p13 = scmp.lt.s32.totalorder %s635_s5, %s629_s30 }
  0x75   : > { %p632_p6 = pneg %p631_p2 }
  0x76   : > { %p638_p3 = por %p637_p13, %p636_p8 }
  0x78   : > { %p639_p7 = pnand %p638_p3, %p632_p6 }
 0x147   : > { %v280_v6 = vpop.f32.mrb[0].mxu0 }
 0x148   : > { %v281_v7 = vadd.f32 %v444_v5, %v280_v6  ;;  %v466_v8 = vpop.f32.mrb[1].mxu0 }
 0x149   : > { %v283_v9 = vpop.f32.mrb[2].mxu0 }
 0x14a   : > { %v467_v10 = vpop.f32.mrb[3].mxu0  ;;  %v286_v11 = vsel %vm242_vm1, %v281_v7, 0.0 }
 0x14b   : > { %287 = vadd.xlane.f32.xlu0 %v286_v11 }
 0x1d8   : > { %v288_v12 = vpop.xlane.xlu0 %287 }
 0x1d9   : > { %v290_v13 = vmul.f32 0.03125, %v288_v12 }
 0x1db   : > { %v291_v14 = vsub.f32 %v281_v7, %v290_v13 }
 0x1dd   : > { %v292_v15 = vmul.f32 %v291_v14, %v291_v14 }
 0x1df   : > { %v293_v16 = vsel %vm242_vm1, %v292_v15, 0.0 }
 0x1e0   : > { %294 = vadd.xlane.f32.xlu0 %v293_v16 }
 0x26d   : > { %v295_v17 = vpop.xlane.xlu0 %294 }
 0x26e   : > { %v296_v18 = vmul.f32 0.03125, %v295_v17 }
 0x270   : > { %v297_v19 = vadd.f32 1e-05, %v296_v18 }
 0x272   : > { %541 = vrsqrt.f32 %v297_v19 }
 0x27c   : > { %v542_v20 = vpop.eup %541 }
 0x27d   : > { %v299_v22 = vmul.f32 %v542_v20, %v291_v14 }
 0x27f   : > { %v304_v24 = vmul.f32 %v448_v21, %v299_v22 }
 0x281   : > { %v309_v25 = vadd.f32 %v449_v23, %v304_v24 }
 0x283   : > { %v310_v27 = vadd.f32 %v309_v25, %v214_v3 }
 0x285   : > { %vm311_vm2 = vcmp.ge.f32.partialorder %v310_v27, 0.0  ;;  %v316_v29 = vmul.f32 %v450_v26, %v310_v27 }
 0x287   : > { %v317_v31 = vsel %vm311_vm2, %v310_v27, %v316_v29 }
 0x288   : > { %v322_v32 = vmul.f32 %v451_v28, %v317_v31 }
 0x28a   : > { %v327_v33 = vadd.f32 %v452_v30, %v322_v32 }
 0x28c   : > { %328 = vst.msk [vmem:[%s212_s20] sm:$0xff] %vm242_vm1, %v327_v33 }
 0x28d   : > { %642 = shalt.err (!%p639_p7)
}
 0x28e   : > { %s643_s8 = scalar_lea.hbm %s913_s27, 128  ;;  %s647_s10 = scalar_lea.hbm %s960_s3, 512 }
 0x28f   : > { %p644_p9 = scmp.ne.s32.totalorder %s913_s27, %s643_s8  ;;  %p648_p0 = scmp.lt.u32.totalorder %s913_s27, %s960_s3 }
 0x290   : > { %p649_p10 = scmp.lt.u32.totalorder %s647_s10, %s643_s8  ;;  %p651_p1 = scmp.lt.u32.totalorder %s643_s8, %s913_s27 }
 0x291   : > { %p645_p12 = pnand %p644_p9, %p841_p4 }
 0x292   : > { %p650_p11 = por %p649_p10, %p648_p0 }
 0x293   : > { %p646_p5 = pneg %p645_p12 }
 0x294   : > { %p652_p2 = por %p651_p1, %p650_p11 }
 0x296   : > { %p653_p6 = pnand %p652_p2, %p646_p5 }
 0x298   : > { %656 = shalt.err (!%p653_p6)
}
 0x299   : > { %478 = dma.vmem_to_hbm [thread:$0]  (%p841_p4), %s915_s17, 128, %s913_s27, %s330_s29  }
 0x29a PF: > { %p500_p8 = scmp.ge.s32.totalorder %s699_s15, 2  ;;  %s355_s28 = sand.u32 1, %s687_s12  }
 0x29b   : > { %p975_p13 = scmp.ne.s32.totalorder %s965_s19, 0  ;;  %s356_s22 = scalar_lea.sflag [#allocation4], %s355_s28 }
 0x29d   : > { %p492_p3 = pnand %p500_p8, %p975_p13 }
 0x29f   : > { %682 = dma.done.wait (!%p492_p3), %s356_s22, 128  }
 0x2a0   : > { %684 = vsyncadd (!%p492_p3), %s356_s22, 4294967168  ;;  %p17_p7 = scmp.ge.s32.totalorder %s831_s4, 6   ;;  %s976_s12 = smov %s691_s13 }
 0x2a1   : > { %s977_s13 = smov %s695_s14  ;;  %s978_s14 = smov %s847_s7 }
 0x2a2   : > { %s979_s15 = smov %s831_s4  ;;  %19 = sbr.rel (!%p17_p7) target bundleno = 6 (0x6), region = 85 }
 0x2a9   :  { %361 = vsyncpa [#allocation3], 1 }
 0x2aa   :  { %363 = vsyncpa [#allocation3 + $0x1], 1 }
 0x2ab   :  { %364 = vsyncpa [#allocation6], 1 }
 0x2ac   :  { %365 = vsyncpa [#allocation4], 1 }
 0x2ad   :  { %367 = vsyncpa [#allocation4 + $0x1], 1 }

// kernel: tpu_custom_call.1
= control target key start
LH: loop header
LB: loop body
LE: loop exit
PB: predicated region body
PF: predicated region fallthrough
CT: control target
= control target key end

     0   :  { %8 = vsyncpa [#allocation3], 0  ;;  %s957_s0 = inlined_call_operand.hbm [shape: f32[26,32], index: 0, kind: input, shape index: {}]   ;;  %s958_s1 = inlined_call_operand.hbm [shape: bf16[32,32], index: 1, kind: input, shape index: {}]   ;;  %s959_s2 = inlined_call_operand.hbm [shape: f32[8,32], index: 2, kind: input, shape index: {}]   ;;  %s960_s3 = inlined_call_operand.hbm [shape: f32[26,32], index: 3, kind: output, shape index: {}]  }
   0x1   :  { %10 = vsyncpa [#allocation3 + $0x1], 0 }
   0x2   :  { %11 = vsyncpa [#allocation6], 0 }
   0x3   :  { %12 = vsyncpa [#allocation4], 0 }
   0x4   :  { %14 = vsyncpa [#allocation4 + $0x1], 0  ;;  %s729_s12 = smov 0   ;;  %s731_s13 = smov 0  }
   0x5   :  { %s733_s14 = smov 0   ;;  %s735_s15 = smov 0  }
   0x6 LB: > { %s750_s16 = sadd.s32 4294967295, %s699_s15   ;;  %s432_s17 = sadd.s32 4294967294, %s699_s15   ;;  %s699_s15 = sphi %s735_s15, %s979_s15   ;;  %s695_s14 = sphi %s733_s14, %s978_s14   ;;  %s691_s13 = sphi %s731_s13, %s977_s13   ;;  %s687_s12 = sphi %s729_s12, %s976_s12  }
   0x7   : > { %p40_p0 = scmp.ne.s32.totalorder %s691_s13, %s687_s12  ;;  %p961_p1 = scmp.eq.s32.totalorder %s750_s16, 0 }
   0x8   : > { %p112_p3 = scmp.eq.s32.totalorder %s432_s17, 3  ;;  %p433_p5 = scmp.ge.s32.totalorder %s699_s15, 1 }
   0x9   : > { %p759_p4 = por %p961_p1, %p40_p0  ;;  %p119_p7 = scmp.lt.s32.totalorder %s699_s15, 5 }
   0xa   : > { %p764_p6 = por %p112_p3, %p40_p0  ;;  %s701_s21 = smov [#allocation5]  }
   0xb   : > { %s964_s18 = scalar_select %p759_p4, 1, 0 }
   0xc   : > { %s965_s19 = scalar_select %p764_p6, 1, 0 }
   0xd   : > { %p769_p8 = pnand %p433_p5, %p119_p7  ;;  %s131_s22 = sshll.u32 %s701_s21, 4  ;;  %s132_s22 = int_to_ptr.vmem [resolvable:$true] %s131_s22 }
   0xe   : > { %s702_s24 = smov [#allocation7]   ;;  %s543_s28 = scalar_lea.hbm %s958_s1, 256 }
   0xf   : > { %s966_s20 = scalar_select %p769_p8, 1, 0 }
  0x10   : > { %p480_p9 = pneg %p769_p8  ;;  %s145_s25 = sshll.u32 %s702_s24, 4  ;;  %s781_s25 = int_to_ptr.vmem [resolvable:$true] %s145_s25 }
  0x11   : > { %p544_p11 = scmp.ne.s32.totalorder %s958_s1, %s543_s28  ;;  %p550_p3 = scmp.lt.u32.totalorder %s543_s28, %s958_s1 }
  0x12   : > { %p777_p10 = pnand %p480_p9, %p961_p1 }
  0x14   : > { %p545_p12 = pneg %p777_p10 }
  0x16   : > { %p546_p13 = pnand %p545_p12, %p544_p11 }
  0x18   : > { %p547_p0 = pneg %p546_p13 }
  0x1a   : > { %p552_p5 = pnand %p550_p3, %p547_p0 }
  0x1c   : > { %555 = shalt.err (!%p552_p5)
}
  0x1d   : > { %s556_s6 = scalar_lea.vmem %s132_s22, 256  ;;  %p564_p2 = scmp.lt.s32.totalorder %s132_s22, %s132_s22 }
  0x1e   : > { %p557_p7 = scmp.ne.s32.totalorder %s132_s22, %s556_s6  ;;  %p565_p6 = scmp.lt.s32.totalorder %s556_s6, %s556_s6 }
  0x20   : > { %p559_p9 = pnand %p557_p7, %p545_p12  ;;  %p566_p4 = por %p565_p6, %p564_p2 }
  0x22   : > { %p560_p1 = pneg %p559_p9 }
  0x24   : > { %p567_p8 = pnand %p566_p4, %p560_p1 }
  0x26   : > { %570 = shalt.err (!%p567_p8)
}
  0x27   : > { %s703_s7 = smov 64   ;;  %s704_s8 = smov 4  }
  0x28   : > { %483 = dma.hbm_to_vmem [thread:$0]  (!%p777_p10), %s958_s1, 256, %s132_s22, [#allocation6], %s703_s7, %s703_s7, %s704_s8  }
  0x29   : > { %s571_s21 = scalar_lea.hbm %s959_s2, 128 }
  0x2a   : > { %p572_p11 = scmp.ne.s32.totalorder %s959_s2, %s571_s21  ;;  %p578_p4 = scmp.lt.u32.totalorder %s571_s21, %s959_s2 }
  0x2c   : > { %p574_p1 = pnand %p572_p11, %p545_p12 }
  0x2e   : > { %p575_p2 = pneg %p574_p1 }
  0x30   : > { %p580_p6 = pnand %p578_p4, %p575_p2 }
  0x32   : > { %583 = shalt.err (!%p580_p6)
}
  0x33   : > { %s584_s22 = scalar_lea.vmem %s781_s25, 128  ;;  %p592_p3 = scmp.lt.s32.totalorder %s781_s25, %s781_s25 }
  0x34   : > { %p585_p8 = scmp.ne.s32.totalorder %s781_s25, %s584_s22  ;;  %p593_p5 = scmp.lt.s32.totalorder %s584_s22, %s584_s22 }
  0x36   : > { %p587_p13 = pnand %p585_p8, %p545_p12  ;;  %p594_p7 = por %p593_p5, %p592_p3 }
  0x38   : > { %p588_p0 = pneg %p587_p13 }
  0x3a   : > { %p595_p9 = pnand %p594_p7, %p588_p0 }
  0x3c   : > { %598 = shalt.err (!%p595_p9)
}
  0x3d   : > { %486 = dma.hbm_to_vmem [thread:$0]  (!%p777_p10), %s959_s2, 128, %s781_s25, [#allocation6]  }
  0x3e   : > { %s831_s4 = sadd.s32 1, %s699_s15   ;;  %s27_s23 = sadd.s32 1, %s695_s14 }
  0x3f   : > { %s24_s5 = ssub.s32 %s699_s15, %s831_s4  ;;  %p34_p12 = scmp.ne.s32.totalorder %s695_s14, %s691_s13 }
  0x40   : > { %p25_p11 = scmp.eq.s32.totalorder %s24_s5, 0  ;;  %p35_p1 = scmp.eq.s32.totalorder %s699_s15, 0 }
  0x41   : > { %p968_p2 = scmp.eq.s32.totalorder %s750_s16, 3  ;;  %p497_p6 = scmp.lt.s32.totalorder %s699_s15, 4 }
  0x42   : > { %s847_s7 = scalar_select %p25_p11, %s695_s14, %s27_s23  }
  0x43   : > { %p841_p4 = por %p968_p2, %p34_p12  ;;  %p36_p8 = por %p35_p1, %p34_p12 }
  0x44   : > { %s156_s8 = sand.u32 1, %s695_s14   ;;  %s438_s25 = sshll.u32 %s699_s15, 7 }
  0x45   : > { %s437_s9 = sshll.u32 %s156_s8, 3  ;;  %s854_s17 = scalar_lea.hbm %s957_s0, %s438_s25 }
  0x46   : > { %s160_s21 = scalar_lea.vmem [#allocation2], %s437_s9  ;;  %p858_p10 = pnand %p497_p6, %p36_p8 }
  0x47   : > { %s167_s24 = sshll.u32 %s160_s21, 4  ;;  %s157_s27 = scalar_lea.sflag [#allocation3], %s156_s8  ;;  %s856_s24 = int_to_ptr.vmem [resolvable:$true] %s167_s24 }
  0x48   : > { %s599_s28 = scalar_lea.hbm %s854_s17, 128  ;;  %p601_p0 = pneg %p858_p10 }
  0x49   : > { %p600_p13 = scmp.ne.s32.totalorder %s854_s17, %s599_s28  ;;  %s604_s30 = scalar_lea.hbm %s957_s0, 512 }
  0x4a   : > { %p605_p7 = scmp.lt.u32.totalorder %s854_s17, %s957_s0  ;;  %p606_p9 = scmp.lt.u32.totalorder %s604_s30, %s599_s28 }
  0x4b   : > { %p602_p3 = pnand %p601_p0, %p600_p13  ;;  %p608_p11 = scmp.lt.u32.totalorder %s599_s28, %s854_s17 }
  0x4c   : > { %p607_p12 = por %p606_p9, %p605_p7 }
  0x4d   : > { %p603_p5 = pneg %p602_p3 }
  0x4e   : > { %p609_p1 = por %p608_p11, %p607_p12 }
  0x50   : > { %p610_p2 = pnand %p609_p1, %p603_p5 }
  0x52   : > { %613 = shalt.err (!%p610_p2)
}
  0x53   : > { %s614_s8 = scalar_lea.vmem %s856_s24, 128  ;;  %s705_s9 = smov [#allocation2]  }
  0x54   : > { %p615_p6 = scmp.ne.s32.totalorder %s856_s24, %s614_s8  ;;  %s619_s25 = sshll.u32 %s705_s9, 4  ;;  %s620_s25 = int_to_ptr.vmem [resolvable:$false] %s619_s25 }
  0x55   : > { %s621_s10 = scalar_lea.vmem %s620_s25, 256  ;;  %p622_p3 = scmp.lt.s32.totalorder %s856_s24, %s620_s25 }
  0x56   : > { %p617_p8 = pnand %p615_p6, %p601_p0  ;;  %p623_p7 = scmp.lt.s32.totalorder %s621_s10, %s614_s8 }
  0x58   : > { %p618_p13 = pneg %p617_p8  ;;  %p624_p9 = por %p623_p7, %p622_p3 }
  0x5a   : > { %p625_p12 = pnand %p624_p9, %p618_p13 }
  0x5c   : > { %628 = shalt.err (!%p625_p12)
}
  0x5d   : > { %490 = dma.hbm_to_vmem [thread:$0]  (!%p858_p10), %s854_s17, 128, %s856_s24, %s157_s27  }
  0x5e   : > { %p971_p5 = scmp.ne.s32.totalorder %s966_s20, 0 }
  0x5f   : > { %s890_s11 = sand.u32 (!%p971_p5), 1, %s691_s13   ;;  %p972_p0 = scmp.ne.s32.totalorder (!%p971_p5), %s964_s18, 0 }
  0x60   : > { %176 = sbr.rel (%p971_p5) target bundleno = 666 (0x29a), region = 32  ;;  %s440_s21 = sshll.u32 (!%p971_p5), %s890_s11, 3 }
  0x61   : > { %s179_s28 = scalar_lea.sflag (!%p971_p5), [#allocation3], %s890_s11  ;;  %s182_s22 = scalar_lea.vmem (!%p971_p5), [#allocation2], %s440_s21 }
  0x67   : > { %674 = dma.done.wait (%p972_p0), %s179_s28, 128  }
  0x68   : > { %676 = vsyncadd (%p972_p0), %s179_s28, 4294967168  ;;  %p973_p10 = scmp.eq.s32.totalorder %s750_s16, 0 }
  0x6a   : > { %678 = dma.done.wait (%p973_p10), [#allocation6], 384   ;;  %p974_p11 = pmov %p973_p10 }
  0x6b   : > { %v706_v0 = vmov 0.0   ;;  %vm707_vm0 = vmmov 0   ;;  %v539_v1 = vld [vmem:[#allocation5] sm:$0xff]   ;;  %v540_v2 = vld [vmem:[#allocation5 + $0x8] sm:$0xff]   ;;  %v214_v3 = vld [vmem:[%s182_s22] sm:$0xff]  ;;  %vm242_vm1 = vcmask 261120  }
  0x6c   : > { %680 = vsyncadd (%p974_p11), [#allocation6], 4294966912  ;;  %460 = vmatprep.subr.bf16.mxu0 %v706_v0  ;;  %464 = vmatprep.mubr.msk.bf16.mxu0 %vm707_vm0, %v706_v0  ;;  %v221_v4 = vpack.c.bf16 %v214_v3, %v214_v3  ;;  %v444_v5 = vld [vmem:[#allocation7] ss:$0 sm:$0xff]  ;;  %v448_v21 = vld [vmem:[#allocation7 + $0x1] ss:$0 sm:$0xff] }
  0x6d   : > { %461 = vmatpush3.bf16.msra.mxu0 %v539_v1  ;;  %v449_v23 = vld [vmem:[#allocation7 + $0x2] ss:$0 sm:$0xff]  ;;  %v450_v26 = vld [vmem:[#allocation7 + $0x3] ss:$0 sm:$0xff]  ;;  %v451_v28 = vld [vmem:[#allocation7 + $0x4] ss:$0 sm:$0xff] }
  0x6e   : > { %462 = vmatprep.subr.bf16.mxu0 %v706_v0  ;;  %v452_v30 = vld [vmem:[#allocation7 + $0x5] ss:$0 sm:$0xff]  ;;  %s454_s18 = sshll.u32 %s750_s16, 7  ;;  %s212_s20 = scalar_lea.vmem [#allocation8], %s440_s21 }
  0x6f   : > { %s343_s17 = sshll.u32 %s212_s20, 4  ;;  %s913_s27 = scalar_lea.hbm %s960_s3, %s454_s18  ;;  %s915_s17 = int_to_ptr.vmem [resolvable:$true] %s343_s17 }
  0x70   : > { %s330_s29 = scalar_lea.sflag [#allocation4], %s890_s11  ;;  %s629_s30 = scalar_lea.vmem %s915_s17, 128 }
  0x71   : > { %463 = vmatpush3.bf16.msra.mxu0 %v540_v2  ;;  %p630_p1 = scmp.ne.s32.totalorder %s915_s17, %s629_s30  ;;  %s708_s16 = smov [#allocation8]  }
  0x72   : > { %s633_s23 = sshll.u32 %s708_s16, 4  ;;  %s634_s23 = int_to_ptr.vmem [resolvable:$false] %s633_s23 }
  0x73   : > { %p631_p2 = pnand %p630_p1, %p841_p4  ;;  %s635_s5 = scalar_lea.vmem %s634_s23, 256 }
  0x74   : > { %465 = vmatmul.mubr.msk.bf16.vlgmr.msra.gmra.mrb[0].mxu0 %vm242_vm1, %v221_v4  ;;  %p636_p8 = scmp.lt.s32.totalorder %s915_s17, %s634_s23  ;;  %p637_p13 = scmp.lt.s32.totalorder %s635_s5, %s629_s30 }
  0x75   : > { %p632_p6 = pneg %p631_p2 }
  0x76   : > { %p638_p3 = por %p637_p13, %p636_p8 }
  0x78   : > { %p639_p7 = pnand %p638_p3, %p632_p6 }
 0x147   : > { %v280_v6 = vpop.f32.mrb[0].mxu0 }
 0x148   : > { %v281_v7 = vadd.f32 %v444_v5, %v280_v6  ;;  %v466_v8 = vpop.f32.mrb[1].mxu0 }
 0x149   : > { %v283_v9 = vpop.f32.mrb[2].mxu0 }
 0x14a   : > { %v467_v10 = vpop.f32.mrb[3].mxu0  ;;  %v286_v11 = vsel %vm242_vm1, %v281_v7, 0.0 }
 0x14b   : > { %287 = vadd.xlane.f32.xlu0 %v286_v11 }
 0x1d8   : > { %v288_v12 = vpop.xlane.xlu0 %287 }
 0x1d9   : > { %v290_v13 = vmul.f32 0.03125, %v288_v12 }
 0x1db   : > { %v291_v14 = vsub.f32 %v281_v7, %v290_v13 }
 0x1dd   : > { %v292_v15 = vmul.f32 %v291_v14, %v291_v14 }
 0x1df   : > { %v293_v16 = vsel %vm242_vm1, %v292_v15, 0.0 }
 0x1e0   : > { %294 = vadd.xlane.f32.xlu0 %v293_v16 }
 0x26d   : > { %v295_v17 = vpop.xlane.xlu0 %294 }
 0x26e   : > { %v296_v18 = vmul.f32 0.03125, %v295_v17 }
 0x270   : > { %v297_v19 = vadd.f32 1e-05, %v296_v18 }
 0x272   : > { %541 = vrsqrt.f32 %v297_v19 }
 0x27c   : > { %v542_v20 = vpop.eup %541 }
 0x27d   : > { %v299_v22 = vmul.f32 %v542_v20, %v291_v14 }
 0x27f   : > { %v304_v24 = vmul.f32 %v448_v21, %v299_v22 }
 0x281   : > { %v309_v25 = vadd.f32 %v449_v23, %v304_v24 }
 0x283   : > { %v310_v27 = vadd.f32 %v309_v25, %v214_v3 }
 0x285   : > { %vm311_vm2 = vcmp.ge.f32.partialorder %v310_v27, 0.0  ;;  %v316_v29 = vmul.f32 %v450_v26, %v310_v27 }
 0x287   : > { %v317_v31 = vsel %vm311_vm2, %v310_v27, %v316_v29 }
 0x288   : > { %v322_v32 = vmul.f32 %v451_v28, %v317_v31 }
 0x28a   : > { %v327_v33 = vadd.f32 %v452_v30, %v322_v32 }
 0x28c   : > { %328 = vst.msk [vmem:[%s212_s20] sm:$0xff] %vm242_vm1, %v327_v33 }
 0x28d   : > { %642 = shalt.err (!%p639_p7)
}
 0x28e   : > { %s643_s8 = scalar_lea.hbm %s913_s27, 128  ;;  %s647_s10 = scalar_lea.hbm %s960_s3, 512 }
 0x28f   : > { %p644_p9 = scmp.ne.s32.totalorder %s913_s27, %s643_s8  ;;  %p648_p0 = scmp.lt.u32.totalorder %s913_s27, %s960_s3 }
 0x290   : > { %p649_p10 = scmp.lt.u32.totalorder %s647_s10, %s643_s8  ;;  %p651_p1 = scmp.lt.u32.totalorder %s643_s8, %s913_s27 }
 0x291   : > { %p645_p12 = pnand %p644_p9, %p841_p4 }
 0x292   : > { %p650_p11 = por %p649_p10, %p648_p0 }
 0x293   : > { %p646_p5 = pneg %p645_p12 }
 0x294   : > { %p652_p2 = por %p651_p1, %p650_p11 }
 0x296   : > { %p653_p6 = pnand %p652_p2, %p646_p5 }
 0x298   : > { %656 = shalt.err (!%p653_p6)
}
 0x299   : > { %478 = dma.vmem_to_hbm [thread:$0]  (%p841_p4), %s915_s17, 128, %s913_s27, %s330_s29  }
 0x29a PF: > { %p500_p8 = scmp.ge.s32.totalorder %s699_s15, 2  ;;  %s355_s28 = sand.u32 1, %s687_s12  }
 0x29b   : > { %p975_p13 = scmp.ne.s32.totalorder %s965_s19, 0  ;;  %s356_s22 = scalar_lea.sflag [#allocation4], %s355_s28 }
 0x29d   : > { %p492_p3 = pnand %p500_p8, %p975_p13 }
 0x29f   : > { %682 = dma.done.wait (!%p492_p3), %s356_s22, 128  }
 0x2a0   : > { %684 = vsyncadd (!%p492_p3), %s356_s22, 4294967168  ;;  %p17_p7 = scmp.ge.s32.totalorder %s831_s4, 6   ;;  %s976_s12 = smov %s691_s13 }
 0x2a1   : > { %s977_s13 = smov %s695_s14  ;;  %s978_s14 = smov %s847_s7 }
 0x2a2   : > { %s979_s15 = smov %s831_s4  ;;  %19 = sbr.rel (!%p17_p7) target bundleno = 6 (0x6), region = 85 }
 0x2a9   :  { %361 = vsyncpa [#allocation3], 1 }
 0x2aa   :  { %363 = vsyncpa [#allocation3 + $0x1], 1 }
 0x2ab   :  { %364 = vsyncpa [#allocation6], 1 }
 0x2ac   :  { %365 = vsyncpa [#allocation4], 1 }
 0x2ad   :  { %367 = vsyncpa [#allocation4 + $0x1], 1 }

</bundles_post_ra>
